<compile_context>
chip_gen: v6e
topology: v6e:2x2x1
jax: 0.10.0
libtpu: 0.0.40
codegen_flags: <defaults>
</compile_context>

<pallas_src>
from functools import partial

import jax
import jax.numpy as jnp
from jax.experimental import pallas as pl
from jax.experimental.pallas import tpu as pltpu


def _round_up(v: int, m: int) -> int:
    return ((v + m - 1) // m) * m


def fused_mlp_kernel(*refs, layer_flags: tuple):
    """refs = (x_ref, <per-layer params...>, o_ref).

    Per layer the params are: w (Ci, Co) [compute dtype], optional bn scale
    (1, Co) f32, bias (1, Co) f32.  layer_flags[i] = (has_scale, has_relu).
    All params use a constant index_map, so they stay resident in VMEM while
    the batch tile streams through; the activation never touches HBM between
    layers.
    """
    x_ref = refs[0]
    o_ref = refs[-1]
    prm = refs[1:-1]

    h = x_ref[...]
    k = 0
    for has_scale, has_relu in layer_flags:
        w = prm[k][...]; k += 1
        if has_scale:
            s = prm[k][...]; k += 1
        b = prm[k][...]; k += 1
        # MXU matmul with f32 accumulation; epilogue (scale/bias/ReLU) in f32.
        y = jnp.dot(h.astype(w.dtype), w, preferred_element_type=jnp.float32)
        if has_scale:
            y = y * s
        y = y + b
        if has_relu:
            y = jnp.maximum(y, 0.0)
        h = y
    o_ref[...] = h.astype(o_ref.dtype)


def mlp_forward(x, params, *, tm: int = 1024, eps: float = 1e-5,
                compute_dtype=jnp.bfloat16, out_dtype=None,
                vmem_budget_bytes: int = 20 * 1024 * 1024,
                single_buffer_threshold_bytes: int = 1 * 1024 * 1024):
    """Fused forward pass of the whole MLP in one pallas_call.

    x: (N, C0).  params: list of dicts from init_mlp_params.
    compute_dtype: matmul-operand dtype (default bf16; pass jnp.float32 for an
    exact path).  Accumulation/epilogue are always f32.
    """
    N, C0 = x.shape
    C_last = params[-1]["w"].shape[1]
    out_dtype = x.dtype if out_dtype is None else out_dtype
    x_item = jnp.dtype(x.dtype).itemsize
    out_item = jnp.dtype(out_dtype).itemsize

    # ---- Fold eval-mode BatchNorm: bias fully folded (f32); BN scale kept as
    # a separate f32 epilogue multiply so bf16 weight quantization is NOT
    # amplified by 1/sqrt(var).
    layers = []
    for p in params:
        w = p["w"].astype(jnp.float32)
        b = p["b"].astype(jnp.float32)
        if p["apply_bn"]:
            s = (p["gamma"] * jax.lax.rsqrt(p["var"] + eps)).astype(jnp.float32)
            b_eff = ((b - p["mean"]) * s + p["beta"]).astype(jnp.float32)
            layers.append((w.astype(compute_dtype), s, b_eff, bool(p["apply_relu"])))
        else:
            layers.append((w.astype(compute_dtype), None, b, bool(p["apply_relu"])))

    param_bytes = sum(
        w.size * w.dtype.itemsize + b.size * 4 + (0 if s is None else s.size * 4)
        for (w, s, b, _) in layers)
    max_c = max([C0, C_last] + [w.shape[1] for (w, _, _, _) in layers])
    single_buffer_consts = param_bytes >= single_buffer_threshold_bytes

    def footprint(tm_):
        """Conservative VMEM footprint estimate (lane/sublane-padded layout)."""
        lane = lambda c: _round_up(c, 128)
        f = 2 * tm_ * lane(C0) * x_item                 # x tile, double-buffered
        f += 2 * tm_ * lane(C_last) * out_item          # out tile, double-buffered
        wbuf = 1 if single_buffer_consts else 2
        f += wbuf * sum(
            _round_up(w.shape[0], 8) * lane(w.shape[1]) * w.dtype.itemsize
            + 8 * lane(w.shape[1]) * 4 * (1 if s is None else 2)
            for (w, s, _, _) in layers)
        f += 3 * tm_ * lane(max_c) * 4                  # live f32 intermediates
        return f

    # ---- Row tiling: multiple of 8 sublanes; >=2 tiles when possible so the
    # "parallel" grid axis can be sharded across both v7x TensorCores; shrink
    # until the estimated footprint fits the VMEM budget (v7x: 64 MiB phys).
    Np = _round_up(max(N, 8), 8)
    TM = max(8, (min(tm, Np) // 8) * 8)
    if Np // TM < 2 and Np >= 16:
        TM = _round_up((Np + 1) // 2, 8)
    while footprint(TM) > vmem_budget_bytes and TM > 8:
        TM = max(8, ((TM // 2) // 8) * 8)
    Np = _round_up(Np, TM)
    n_tiles = Np // TM

    # ---- x is passed zero-copy (no wrapper-side pad/cast pass over HBM) when
    # its row count already matches the tiling; it is cast to the compute
    # dtype inside the kernel (reading f32 once beats an extra HBM round trip).
    if Np == N:
        xin = x
    else:
        xin = jnp.zeros((Np, C0), x.dtype).at[:N].set(x)

    const_mode = pl.Buffered(1) if single_buffer_consts else None

    def _const_spec(shape):
        # Constant index_map -> resident in VMEM across the whole grid.
        if const_mode is None:
            return pl.BlockSpec(shape, lambda i: (0, 0))
        return pl.BlockSpec(shape, lambda i: (0, 0), pipeline_mode=const_mode)

    operands = [xin]
    in_specs = [pl.BlockSpec((TM, C0), lambda i: (i, 0))]
    layer_flags = []
    flops = 0
    for (w, s, b, relu) in layers:
        ci, co = w.shape
        operands.append(w)
        in_specs.append(_const_spec((ci, co)))
        if s is not None:
            operands.append(s)
            in_specs.append(_const_spec((1, co)))
        operands.append(b)
        in_specs.append(_const_spec((1, co)))
        layer_flags.append((s is not None, relu))
        flops += 2 * N * ci * co                         # logical (un-padded) FLOPs

    bytes_accessed = N * C0 * x_item + param_bytes + N * C_last * out_item

    kernel = partial(fused_mlp_kernel, layer_flags=tuple(layer_flags))
    vmem_limit = int(min(max(2 * footprint(TM) + (2 << 20), 16 << 20), 40 << 20))

    out = pl.pallas_call(
        kernel,
        out_shape=jax.ShapeDtypeStruct((Np, C_last), out_dtype),
        grid=(n_tiles,),
        in_specs=in_specs,
        out_specs=pl.BlockSpec((TM, C_last), lambda i: (i, 0)),
        compiler_params=pltpu.CompilerParams(
            dimension_semantics=("parallel",),
            vmem_limit_bytes=vmem_limit),
        cost_estimate=pl.CostEstimate(
            flops=flops, transcendentals=0, bytes_accessed=bytes_accessed),
    )(*operands)

    return out if Np == N else out[:N]


def init_mlp_params(key, num_channels):
    """Deterministic parameter init mimicking PyTorch defaults (shapes only)."""
    params = []
    n_layers = len(num_channels) - 1
    for li in range(n_layers):
        c_in, c_out = num_channels[li], num_channels[li + 1]
        key, kw, kb, kg, kbe, km, kv = jax.random.split(key, 7)
        bound = 1.0 / jnp.sqrt(jnp.float32(c_in))
        w = jax.random.uniform(kw, (c_in, c_out), jnp.float32, -bound, bound)
        b = jax.random.uniform(kb, (1, c_out), jnp.float32, -bound, bound)
        last = li == n_layers - 1
        if last:  # plain_last=True -> Identity norm / Identity activation
            gamma = jnp.ones((1, c_out), jnp.float32)
            beta = jnp.zeros((1, c_out), jnp.float32)
            mean = jnp.zeros((1, c_out), jnp.float32)
            var = jnp.ones((1, c_out), jnp.float32)
        else:     # BatchNorm1d with (synthetic) running stats + affine params
            gamma = 1.0 + 0.1 * jax.random.normal(kg, (1, c_out), jnp.float32)
            beta = 0.1 * jax.random.normal(kbe, (1, c_out), jnp.float32)
            mean = 0.1 * jax.random.normal(km, (1, c_out), jnp.float32)
            var = jnp.abs(1.0 + 0.1 * jax.random.normal(kv, (1, c_out), jnp.float32))
        params.append(dict(w=w, b=b, gamma=gamma, beta=beta, mean=mean, var=var,
                           apply_bn=not last, apply_relu=not last))
    return params


def mlp_forward_ref(x, params, eps=1e-5):
    """Pure-JAX reference (unfused, unfolded) for a sanity check."""
    for p in params:
        y = x @ p["w"] + p["b"]
        if p["apply_bn"]:
            y = (y - p["mean"]) / jnp.sqrt(p["var"] + eps) * p["gamma"] + p["beta"]
        if p["apply_relu"]:
            y = jnp.maximum(y, 0.0)
        x = y
    return x


if __name__ == "__main__":
    key = jax.random.PRNGKey(0)
    key, kx = jax.random.split(key)

    num_channels = (16, 32, 32, 8)   # MLP(num_channels=(16, 32, 32, 8))
    N = 16                           # batch of 16 samples -> 2 row tiles
    x = jax.random.normal(kx, (N, num_channels[0]), jnp.float32)

    params = init_mlp_params(key, num_channels)
    ref = mlp_forward_ref(x, params)

    # Default path: bf16 matmul operands, f32 accumulation/epilogue, f32 BN scale.
    out = jax.block_until_ready(mlp_forward(x, params))
    assert out.shape == (N, num_channels[-1])
    assert out.dtype == x.dtype
    assert bool(jnp.all(jnp.isfinite(out)))
    assert jnp.allclose(out, ref, atol=3e-2, rtol=3e-2)

    # Exact path: f32 matmul operands.
    out_f32 = jax.block_until_ready(mlp_forward(x, params, compute_dtype=jnp.float32))
    assert out_f32.shape == (N, num_channels[-1])
    assert jnp.allclose(out_f32, ref, atol=1e-5, rtol=1e-5)

    print("KERNEL_OK")
</pallas_src>

<mosaic_0001>
module attributes {stable_mosaic.version = 11 : i64} {
  func.func @fused_mlp_kernel(%arg0: i32, %arg1: memref<8x16xf32, #tpu.memory_space<vmem>>, %arg2: memref<16x32xbf16, #tpu.memory_space<vmem>>, %arg3: memref<1x32xf32, #tpu.memory_space<vmem>>, %arg4: memref<1x32xf32, #tpu.memory_space<vmem>>, %arg5: memref<32x32xbf16, #tpu.memory_space<vmem>>, %arg6: memref<1x32xf32, #tpu.memory_space<vmem>>, %arg7: memref<1x32xf32, #tpu.memory_space<vmem>>, %arg8: memref<32x8xbf16, #tpu.memory_space<vmem>>, %arg9: memref<1x8xf32, #tpu.memory_space<vmem>>, %arg10: memref<8x8xf32, #tpu.memory_space<vmem>>) attributes {dimension_semantics = [#tpu.dimension_semantics<parallel>], iteration_bounds = array<i64: 2>, scalar_prefetch = 0 : i64, scratch_operands = 0 : i64, tpu.core_type = #tpu.core_type<tc>, window_params = [{transform_indices = @transform_0, window_bounds = array<i64: 8, 16>}, {pipeline_mode = #tpu.pipeline_mode<synchronous>, transform_indices = @transform_1, window_bounds = array<i64: 16, 32>}, {pipeline_mode = #tpu.pipeline_mode<synchronous>, transform_indices = @transform_2, window_bounds = array<i64: 1, 32>}, {pipeline_mode = #tpu.pipeline_mode<synchronous>, transform_indices = @transform_3, window_bounds = array<i64: 1, 32>}, {pipeline_mode = #tpu.pipeline_mode<synchronous>, transform_indices = @transform_4, window_bounds = array<i64: 32, 32>}, {pipeline_mode = #tpu.pipeline_mode<synchronous>, transform_indices = @transform_5, window_bounds = array<i64: 1, 32>}, {pipeline_mode = #tpu.pipeline_mode<synchronous>, transform_indices = @transform_6, window_bounds = array<i64: 1, 32>}, {pipeline_mode = #tpu.pipeline_mode<synchronous>, transform_indices = @transform_7, window_bounds = array<i64: 32, 8>}, {pipeline_mode = #tpu.pipeline_mode<synchronous>, transform_indices = @transform_8, window_bounds = array<i64: 1, 8>}, {transform_indices = @transform_9, window_bounds = array<i64: 8, 8>}]} {
    %c0 = arith.constant 0 : index
    %c0_0 = arith.constant 0 : index
    %0 = vector.load %arg1[%c0, %c0_0] : memref<8x16xf32, #tpu.memory_space<vmem>>, vector<8x16xf32>
    %c0_1 = arith.constant 0 : index
    %c0_2 = arith.constant 0 : index
    %1 = vector.load %arg2[%c0_1, %c0_2] : memref<16x32xbf16, #tpu.memory_space<vmem>>, vector<16x32xbf16>
    %c0_3 = arith.constant 0 : index
    %c0_4 = arith.constant 0 : index
    %2 = vector.load %arg3[%c0_3, %c0_4] : memref<1x32xf32, #tpu.memory_space<vmem>>, vector<1x32xf32>
    %c0_5 = arith.constant 0 : index
    %c0_6 = arith.constant 0 : index
    %3 = vector.load %arg4[%c0_5, %c0_6] : memref<1x32xf32, #tpu.memory_space<vmem>>, vector<1x32xf32>
    %4 = arith.truncf %0 : vector<8x16xf32> to vector<8x16xbf16>
    %cst = arith.constant dense<0.000000e+00> : vector<8x32xf32>
    %5 = tpu.matmul %4, %1, %cst {dimension_numbers = #tpu.dot_dimension_numbers<[1], [0], [0], [1], [0, 0, 1, 1], [], []>} : vector<8x16xbf16>, vector<16x32xbf16>, vector<8x32xf32> -> vector<8x32xf32>
    %6 = vector.broadcast %2 : vector<1x32xf32> to vector<8x32xf32>
    %7 = arith.mulf %5, %6 : vector<8x32xf32>
    %8 = vector.broadcast %3 : vector<1x32xf32> to vector<8x32xf32>
    %9 = arith.addf %7, %8 : vector<8x32xf32>
    %cst_7 = arith.constant 0.000000e+00 : f32
    %10 = vector.broadcast %cst_7 : f32 to vector<8x32xf32>
    %11 = arith.maximumf %9, %10 : vector<8x32xf32>
    %c0_8 = arith.constant 0 : index
    %c0_9 = arith.constant 0 : index
    %12 = vector.load %arg5[%c0_8, %c0_9] : memref<32x32xbf16, #tpu.memory_space<vmem>>, vector<32x32xbf16>
    %c0_10 = arith.constant 0 : index
    %c0_11 = arith.constant 0 : index
    %13 = vector.load %arg6[%c0_10, %c0_11] : memref<1x32xf32, #tpu.memory_space<vmem>>, vector<1x32xf32>
    %c0_12 = arith.constant 0 : index
    %c0_13 = arith.constant 0 : index
    %14 = vector.load %arg7[%c0_12, %c0_13] : memref<1x32xf32, #tpu.memory_space<vmem>>, vector<1x32xf32>
    %15 = arith.truncf %11 : vector<8x32xf32> to vector<8x32xbf16>
    %cst_14 = arith.constant dense<0.000000e+00> : vector<8x32xf32>
    %16 = tpu.matmul %15, %12, %cst_14 {dimension_numbers = #tpu.dot_dimension_numbers<[1], [0], [0], [1], [0, 0, 1, 1], [], []>} : vector<8x32xbf16>, vector<32x32xbf16>, vector<8x32xf32> -> vector<8x32xf32>
    %17 = vector.broadcast %13 : vector<1x32xf32> to vector<8x32xf32>
    %18 = arith.mulf %16, %17 : vector<8x32xf32>
    %19 = vector.broadcast %14 : vector<1x32xf32> to vector<8x32xf32>
    %20 = arith.addf %18, %19 : vector<8x32xf32>
    %cst_15 = arith.constant 0.000000e+00 : f32
    %21 = vector.broadcast %cst_15 : f32 to vector<8x32xf32>
    %22 = arith.maximumf %20, %21 : vector<8x32xf32>
    %c0_16 = arith.constant 0 : index
    %c0_17 = arith.constant 0 : index
    %23 = vector.load %arg8[%c0_16, %c0_17] : memref<32x8xbf16, #tpu.memory_space<vmem>>, vector<32x8xbf16>
    %c0_18 = arith.constant 0 : index
    %c0_19 = arith.constant 0 : index
    %24 = vector.load %arg9[%c0_18, %c0_19] : memref<1x8xf32, #tpu.memory_space<vmem>>, vector<1x8xf32>
    %25 = arith.truncf %22 : vector<8x32xf32> to vector<8x32xbf16>
    %cst_20 = arith.constant dense<0.000000e+00> : vector<8x8xf32>
    %26 = tpu.matmul %25, %23, %cst_20 {dimension_numbers = #tpu.dot_dimension_numbers<[1], [0], [0], [1], [0, 0, 1, 1], [], []>} : vector<8x32xbf16>, vector<32x8xbf16>, vector<8x8xf32> -> vector<8x8xf32>
    %27 = vector.broadcast %24 : vector<1x8xf32> to vector<8x8xf32>
    %28 = arith.addf %26, %27 : vector<8x8xf32>
    %c0_21 = arith.constant 0 : index
    %c0_22 = arith.constant 0 : index
    %29 = vector.load %arg10[%c0_21, %c0_22] : memref<8x8xf32, #tpu.memory_space<vmem>>, vector<8x8xf32>
    tpu.vector_store %arg10[%c0_21, %c0_22], %28 {strides = array<i32>} : memref<8x8xf32, #tpu.memory_space<vmem>>, vector<8x8xf32>,
    return
  }
  func.func @transform_0(%arg0: i32) -> (i32, i32) {
    %c0_i32 = arith.constant 0 : i32
    %c0_i32_0 = arith.constant 0 : i32
    return %arg0, %c0_i32 : i32, i32
  }
  func.func @transform_1(%arg0: i32) -> (i32, i32) {
    %c0_i32 = arith.constant 0 : i32
    %c0_i32_0 = arith.constant 0 : i32
    %c0_i32_1 = arith.constant 0 : i32
    return %c0_i32, %c0_i32_0 : i32, i32
  }
  func.func @transform_2(%arg0: i32) -> (i32, i32) {
    %c0_i32 = arith.constant 0 : i32
    %c0_i32_0 = arith.constant 0 : i32
    %c0_i32_1 = arith.constant 0 : i32
    return %c0_i32, %c0_i32_0 : i32, i32
  }
  func.func @transform_3(%arg0: i32) -> (i32, i32) {
    %c0_i32 = arith.constant 0 : i32
    %c0_i32_0 = arith.constant 0 : i32
    %c0_i32_1 = arith.constant 0 : i32
    return %c0_i32, %c0_i32_0 : i32, i32
  }
  func.func @transform_4(%arg0: i32) -> (i32, i32) {
    %c0_i32 = arith.constant 0 : i32
    %c0_i32_0 = arith.constant 0 : i32
    %c0_i32_1 = arith.constant 0 : i32
    return %c0_i32, %c0_i32_0 : i32, i32
  }
  func.func @transform_5(%arg0: i32) -> (i32, i32) {
    %c0_i32 = arith.constant 0 : i32
    %c0_i32_0 = arith.constant 0 : i32
    %c0_i32_1 = arith.constant 0 : i32
    return %c0_i32, %c0_i32_0 : i32, i32
  }
  func.func @transform_6(%arg0: i32) -> (i32, i32) {
    %c0_i32 = arith.constant 0 : i32
    %c0_i32_0 = arith.constant 0 : i32
    %c0_i32_1 = arith.constant 0 : i32
    return %c0_i32, %c0_i32_0 : i32, i32
  }
  func.func @transform_7(%arg0: i32) -> (i32, i32) {
    %c0_i32 = arith.constant 0 : i32
    %c0_i32_0 = arith.constant 0 : i32
    %c0_i32_1 = arith.constant 0 : i32
    return %c0_i32, %c0_i32_0 : i32, i32
  }
  func.func @transform_8(%arg0: i32) -> (i32, i32) {
    %c0_i32 = arith.constant 0 : i32
    %c0_i32_0 = arith.constant 0 : i32
    %c0_i32_1 = arith.constant 0 : i32
    return %c0_i32, %c0_i32_0 : i32, i32
  }
  func.func @transform_9(%arg0: i32) -> (i32, i32) {
    %c0_i32 = arith.constant 0 : i32
    %c0_i32_0 = arith.constant 0 : i32
    return %arg0, %c0_i32 : i32, i32
  }
}

</mosaic_0001>

<bundles_post_ra>
// kernel: tpu_custom_call.1
= control target key start
LH: loop header
LB: loop body
LE: loop exit
PB: predicated region body
PF: predicated region fallthrough
CT: control target
= control target key end

     0   :  { %14 = vsyncpa [#allocation3], 0  ;;  %s962_s0 = inlined_call_operand.vmem [shape: f32[16,16], index: 0, kind: input, shape index: {}]   ;;  %s963_s1 = inlined_call_operand.hbm [shape: bf16[16,32], index: 1, kind: input, shape index: {}]   ;;  %s964_s2 = inlined_call_operand.vmem [shape: f32[1,32], index: 2, kind: input, shape index: {}]   ;;  %s965_s3 = inlined_call_operand.vmem [shape: f32[1,32], index: 3, kind: input, shape index: {}]   ;;  %s966_s4 = inlined_call_operand.hbm [shape: bf16[32,32], index: 4, kind: input, shape index: {}]   ;;  %s967_s5 = inlined_call_operand.vmem [shape: f32[1,32], index: 5, kind: input, shape index: {}]   ;;  %s968_s6 = inlined_call_operand.vmem [shape: f32[1,32], index: 6, kind: input, shape index: {}]   ;;  %s969_s7 = inlined_call_operand.vmem [shape: bf16[32,8], index: 7, kind: input, shape index: {}]   ;;  %s970_s8 = inlined_call_operand.vmem [shape: f32[1,8], index: 8, kind: input, shape index: {}]   ;;  %s971_s9 = inlined_call_operand.vmem [shape: f32[16,8], index: 9, kind: output, shape index: {}]  }
   0x1   :  { %15 = vsyncpa [#allocation5], 0  ;;  %s870_s30 = smov 0  }
   0x2 LB: > { %s876_s10 = sadd.s32 4294967295, %s812_s30   ;;  %p654_p0 = scmp.ge.s32.totalorder %s812_s30, 1  ;;  %s812_s30 = sphi %s870_s30, %s21_s30  }
   0x3   : > { %p246_p1 = scmp.lt.s32.totalorder %s812_s30, 3  ;;  %s814_s11 = smov [#allocation2]  }
   0x4   : > { %s258_s12 = sshll.u32 %s814_s11, 4  ;;  %p723_p3 = scmp.eq.s32.totalorder %s876_s10, 0  ;;  %s259_s12 = int_to_ptr.vmem [resolvable:$true] %s258_s12 }
   0x5   : > { %p880_p2 = pnand %p654_p0, %p246_p1  ;;  %s815_s14 = smov [#allocation4]  }
   0x6   : > { %s277_s15 = sshll.u32 %s815_s14, 4  ;;  %s757_s17 = scalar_lea.vmem %s259_s12, 128  ;;  %s278_s15 = int_to_ptr.vmem [resolvable:$true] %s277_s15 }
   0x7   : > { %p716_p4 = pneg %p880_p2  ;;  %p758_p7 = scmp.ne.s32.totalorder %s259_s12, %s757_s17 }
   0x8   : > { %p765_p10 = scmp.lt.s32.totalorder %s259_s12, %s259_s12  ;;  %p766_p11 = scmp.lt.s32.totalorder %s757_s17, %s757_s17 }
   0x9   : > { %p889_p5 = pnand %p723_p3, %p716_p4 }
   0xa   : > { %p767_p12 = por %p766_p11, %p765_p10 }
   0xb   : > { %p748_p6 = pneg %p889_p5 }
   0xd   : > { %p760_p8 = pnand %p758_p7, %p748_p6 }
   0xf   : > { %p761_p9 = pneg %p760_p8 }
  0x11   : > { %p768_p13 = pnand %p767_p12, %p761_p9 }
  0x13   : > { %771 = shalt.err (!%p768_p13)
}
  0x14   : > { %s816_s18 = smov 64   ;;  %s817_s19 = smov 4  }
  0x15   : > { %719 = dma.hbm_to_vmem [thread:$0]  (!%p889_p5), %s963_s1, 128, %s259_s12, [#allocation3], %s816_s18, %s816_s18, %s817_s19  }
  0x16   : > { %s783_s22 = scalar_lea.vmem %s278_s15, 256  ;;  %p791_p7 = scmp.lt.s32.totalorder %s278_s15, %s278_s15 }
  0x17   : > { %p784_p0 = scmp.ne.s32.totalorder %s278_s15, %s783_s22  ;;  %p792_p8 = scmp.lt.s32.totalorder %s783_s22, %s783_s22 }
  0x19   : > { %p786_p1 = pnand %p784_p0, %p748_p6  ;;  %p793_p10 = por %p792_p8, %p791_p7 }
  0x1b   : > { %p787_p4 = pneg %p786_p1 }
  0x1d   : > { %p794_p9 = pnand %p793_p10, %p787_p4 }
  0x1f   : > { %797 = shalt.err (!%p794_p9)
}
  0x20   : > { %722 = dma.hbm_to_vmem [thread:$0]  (!%p889_p5), %s966_s4, 256, %s278_s15, [#allocation5], %s816_s18, %s816_s18, %s817_s19  }
  0x21   : > { %312 = sbr.rel (%p880_p2) target bundleno = 650 (0x28a), region = 56 }
  0x26   : > { %803 = dma.done.wait (%p723_p3), [#allocation3], 128  }
  0x27   : > { %805 = vsyncadd (%p723_p3), [#allocation3], 4294967168 }
  0x28   : > { %807 = dma.done.wait (%p723_p3), [#allocation5], 256  }
  0x29   : > { %809 = vsyncadd (%p723_p3), [#allocation5], 4294967040  ;;  %p350_p6 = scmp.lt.s32.totalorder %s876_s10, 1  ;;  %v818_v0 = vmov 0.0   ;;  %vm819_vm0 = vmmov 0   ;;  %v741_v1 = vld [vmem:[#allocation2] sm:$0xff]  }
  0x2a   : > { %686 = vmatprep.subr.bf16.mxu0 %v818_v0  ;;  %688 = vmatprep.mubr.msk.bf16.mxu0 %vm819_vm0, %v818_v0  ;;  %vm371_vm1 = vcmask 130048   ;;  %v742_v4 = vld [vmem:[#allocation4 + $0x8] sm:$0xff]   ;;  %v743_v5 = vld [vmem:[#allocation4] sm:$0xff]   ;;  %v665_v6 = vld [vmem:[%s964_s2] ss:$0 sm:$0xff]  ;;  %vm449_vm2 = vcmask 261120  }
  0x2b   : > { %s975_s10 = smov (!%p350_p6, %s876_s10), 1  ;;  %692 = vmatprep.subr.bf16.mxu1 %v818_v0  ;;  %696 = vmatprep.mubr.msk.bf16.mxu1 %vm819_vm0, %v818_v0  ;;  %v666_v7 = vld [vmem:[%s965_s3] ss:$0 sm:$0xff]  ;;  %v744_v16 = vld [vmem:[%s969_s7 + $0x8] sm:$0xff]   ;;  %vm575_vm3 = vcmask 64512  }
  0x2c   : > { %s661_s25 = sshll.u32 %s975_s10, 3  ;;  %687 = vmatpush3.bf16.msra.mxu0 %v741_v1  ;;  %693 = vmatpush3.bf16.msra.mxu1 %v742_v4  ;;  %v745_v17 = vld [vmem:[%s969_s7] sm:$0xff]  }
  0x2d   : > { %s353_s28 = scalar_lea.vmem %s962_s0, %s661_s25  ;;  %700 = vmatprep.subr.bf16.mxu0 %v818_v0  ;;  %694 = vmatprep.subr.bf16.mxu1 %v818_v0  ;;  %v670_v18 = vld [vmem:[%s967_s5] ss:$0 sm:$0xff]  ;;  %s357_s27 = scalar_lea.vmem %s971_s9, %s661_s25 }
  0x2e   : > { %v359_v2 = vld [vmem:[%s353_s28] sm:$0xff] }
  0x2f   : > { %v364_v3 = vpack.c.bf16 %v359_v2, %v359_v2  ;;  %v671_v19 = vld [vmem:[%s968_s6] ss:$0 sm:$0xff] }
  0x30   : > { %695 = vmatpush3.bf16.msra.mxu1 %v743_v5  ;;  %v672_v28 = vld [vmem:[%s970_s8] ss:$0 sm:$0xff] }
  0x31   : > { %689 = vmatmul.mubr.msk.bf16.vlgmr.msra.gmra.mxu0 %vm371_vm1, %v364_v3 }
  0x32   : > { %704 = vmatprep.mubr.msk.bf16.mxu0 %vm819_vm0, %v818_v0  ;;  %701 = vmatpush3.bf16.msra.mxu0 %v744_v16 }
  0x33   : > { %702 = vmatprep.subr.bf16.mxu0 %v818_v0 }
  0x36   : > { %703 = vmatpush3.bf16.msra.mxu0 %v745_v17 }
  0xf1   : > { %v409_v8 = vpop.f32.mrf.mxu0 }
  0xf2   : > { %v421_v9 = vmul.f32 %v665_v6, %v409_v8 }
  0xf3   : > { %v690_v10 = vpop.f32.mrf.mxu0 }
  0xf4   : > { %v428_v11 = vadd.f32 %v666_v7, %v421_v9 }
  0xf5   : > { %v412_v12 = vpop.f32.mrf.mxu0 }
  0xf6   : > { %v429_v13 = vmax.f32 %v428_v11, 0.0 }
  0xf7   : > { %v691_v14 = vpop.f32.mrf.mxu0 }
  0xf8   : > { %v436_v15 = vpack.c.bf16 %v429_v13, %v429_v13 }
  0xfa   : > { %697 = vmatmul.mubr.msk.bf16.vlgmr.msra.gmra.mxu1 %vm449_vm2, %v436_v15 }
 0x1ba   : > { %v487_v20 = vpop.f32.mrf.mxu1 }
 0x1bb   : > { %v499_v21 = vmul.f32 %v670_v18, %v487_v20 }
 0x1bc   : > { %v698_v22 = vpop.f32.mrf.mxu1 }
 0x1bd   : > { %v506_v23 = vadd.f32 %v671_v19, %v499_v21 }
 0x1be   : > { %v490_v24 = vpop.f32.mrf.mxu1 }
 0x1bf   : > { %v507_v25 = vmax.f32 %v506_v23, 0.0 }
 0x1c0   : > { %v699_v26 = vpop.f32.mrf.mxu1 }
 0x1c1   : > { %v513_v27 = vpack.c.bf16 %v507_v25, %v507_v25 }
 0x1c3   : > { %705 = vmatmul.mubr.msk.bf16.vlgmr.msra.gmra.mxu0 %vm449_vm2, %v513_v27 }
 0x283   : > { %v569_v29 = vpop.f32.mrf.mxu0 }
 0x284   : > { %v570_v30 = vadd.f32 %v672_v28, %v569_v29 }
 0x285   : > { %v706_v31 = vpop.f32.mrf.mxu0 }
 0x286   : > { %576 = vst.msk [vmem:[%s357_s27] sm:$0xff] %vm575_vm3, %v570_v30 }
 0x287   : > { %v572_v32 = vpop.f32.mrf.mxu0 }
 0x289   : > { %v707_v33 = vpop.f32.mrf.mxu0 }
 0x28a PF: > { %s21_s30 = sadd.s32 1, %s812_s30  }
 0x28b   : > { %p18_p2 = scmp.ge.s32.totalorder %s21_s30, 4  }
 0x28d   :  { %20 = sbr.rel (!%p18_p2) target bundleno = 2 (0x2), region = 95 }
 0x292   :  { %596 = vsyncpa [#allocation3], 1 }
 0x293   :  { %598 = vsyncpa [#allocation3 + $0x1], 1 }
 0x294   :  { %599 = vsyncpa [#allocation5], 1 }

</bundles_post_ra>
